<compile_context>
chip_gen: v6e
topology: v6e:2x2x1
jax: 0.10.0
libtpu: 0.0.40
codegen_flags: <defaults>
</compile_context>

<pallas_src>
import functools

import jax
import jax.numpy as jnp
from jax.experimental import pallas as pl
from jax.experimental.pallas import tpu as pltpu


# ---------------------------------------------------------------------------
# Tiling / chip helpers
# ---------------------------------------------------------------------------

def _round_up(a, m):
    return (a + m - 1) // m * m


@functools.lru_cache(maxsize=None)
def _vmem_limit_bytes():
    """Generation-aware scoped-VMEM limit: ~85% of physical VMEM, capped at 110 MiB.
    v5e/v6e (128 MiB) -> ~108 MiB, v7x (64 MiB) -> ~54 MiB; 48 MiB fallback."""
    try:
        cap = getattr(pltpu.get_tpu_info(), "vmem_capacity_bytes", None)
        if cap:
            return int(min(int(cap) * 0.85, 110 * 1024 * 1024))
    except Exception:
        pass
    return 48 * 1024 * 1024


def _compiler_params(dims):
    return pltpu.CompilerParams(dimension_semantics=dims,
                                vmem_limit_bytes=_vmem_limit_bytes())


def _pick_row_tile(rows, k_dim, itemsize, *, target=256, budget_bytes=12 << 20):
    """Row tile: multiple of 8, aimed at `target` rows (fills the 256-deep MXU on
    v6e/v7x, 2x128 on v5e), capped so the double-buffered activation slab plus the
    fp32 LN scratch stays under `budget_bytes`.  Grid uses pl.cdiv, so the tail
    row block may be partial (no full-activation padding per call)."""
    padded8 = _round_up(max(rows, 1), 8)
    per_row = max(1, k_dim * (3 * itemsize + 4))
    cap = max(8, (budget_bytes // per_row) // 8 * 8)
    tm = max(8, min(target, padded8, cap) // 8 * 8)
    return tm, padded8


def _pick_col_tile(n_out, cap=512):
    """Lane-dense column tile: largest multiple of 128 dividing n_out (capped);
    otherwise the full width as a single block.
    TODO(synk): pad non-128-multiple weight output dims at init for fully
    lane-dense stores (needs residual padding for the projection kernels)."""
    if n_out % 128 == 0:
        t = min(cap, n_out)
        t -= t % 128
        while t > 128 and n_out % t != 0:
            t -= 128
        return t
    return n_out


def _erf_approx(x):
    # Abramowitz & Stegun 7.1.26, |err| < 1.5e-7 -> exact-GELU semantics of nn.GELU().
    a1, a2, a3, a4, a5 = 0.254829592, -0.284496736, 1.421413741, -1.453152027, 1.061405429
    p = 0.3275911
    sign = jnp.where(x >= 0.0, 1.0, -1.0)
    ax = jnp.abs(x)
    t = 1.0 / (1.0 + p * ax)
    poly = ((((a5 * t + a4) * t + a3) * t + a2) * t + a1) * t
    return sign * (1.0 - poly * jnp.exp(-ax * ax))


# ---------------------------------------------------------------------------
# Kernel 1: fused LayerNorm -> matmul (+ optional exact GELU)
#   out[i, j] = act( LN(x)[i, :] @ W[:, j] + bias[j] )
# Grid: (row tiles [parallel], col tiles [arbitrary]).  The normalized row tile
# is computed once per row tile (at j == 0) into a VMEM scratch (input dtype,
# so the MXU sees bf16 operands for bf16 models) and reused across column tiles.
# ---------------------------------------------------------------------------

def _ln_matmul_kernel(x_ref, g_ref, b_ref, w_ref, bias_ref, o_ref, xn_ref, *,
                      eps, activation):
    @pl.when(pl.program_id(1) == 0)
    def _():
        x = x_ref[...].astype(jnp.float32)
        inv_d = 1.0 / x.shape[-1]
        mean = jnp.sum(x, axis=-1, keepdims=True) * inv_d
        xc = x - mean
        var = jnp.sum(xc * xc, axis=-1, keepdims=True) * inv_d   # mean-subtracted (stable)
        inv = jax.lax.rsqrt(var + eps)
        xn = xc * inv * g_ref[...].astype(jnp.float32) + b_ref[...].astype(jnp.float32)
        xn_ref[...] = xn.astype(xn_ref.dtype)                    # keep MXU operand dtype

    # No fp32 up-cast of operands; fp32 accumulation via preferred_element_type.
    y = jnp.dot(xn_ref[...], w_ref[...], preferred_element_type=jnp.float32)
    y = y + bias_ref[...].astype(jnp.float32)
    if activation == "gelu":
        y = 0.5 * y * (1.0 + _erf_approx(y * 0.7071067811865476))
    o_ref[...] = y.astype(o_ref.dtype)


def fused_ln_matmul(x2, gamma, beta, W, bias, *, eps=1e-5, activation=None):
    rows, dim = x2.shape
    n_out = W.shape[1]
    tm, padded = _pick_row_tile(rows, dim, x2.dtype.itemsize)
    tn = _pick_col_tile(n_out)
    xp = x2 if padded == rows else jnp.pad(x2, ((0, padded - rows), (0, 0)))

    out = pl.pallas_call(
        functools.partial(_ln_matmul_kernel, eps=eps, activation=activation),
        out_shape=jax.ShapeDtypeStruct((padded, n_out), x2.dtype),
        grid_spec=pltpu.PrefetchScalarGridSpec(
            num_scalar_prefetch=0,
            grid=(pl.cdiv(padded, tm), pl.cdiv(n_out, tn)),
            in_specs=[
                pl.BlockSpec((tm, dim), lambda i, j: (i, 0)),
                pl.BlockSpec((1, dim), lambda i, j: (0, 0)),
                pl.BlockSpec((1, dim), lambda i, j: (0, 0)),
                pl.BlockSpec((dim, tn), lambda i, j: (0, j)),
                pl.BlockSpec((1, tn), lambda i, j: (0, j)),
            ],
            out_specs=pl.BlockSpec((tm, tn), lambda i, j: (i, j)),
            scratch_shapes=[pltpu.VMEM((tm, dim), x2.dtype)],
        ),
        compiler_params=_compiler_params(("parallel", "arbitrary")),
    )(xp, gamma.reshape(1, dim), beta.reshape(1, dim), W, bias.reshape(1, n_out))
    return out[:rows] if padded != rows else out


# ---------------------------------------------------------------------------
# Kernel 2: matmul + bias + residual (second linear of each sub-block)
#   out = h @ W + bias + residual
# ---------------------------------------------------------------------------

def _matmul_bias_res_kernel(h_ref, w_ref, bias_ref, res_ref, o_ref):
    y = jnp.dot(h_ref[...], w_ref[...], preferred_element_type=jnp.float32)
    y = y + bias_ref[...].astype(jnp.float32) + res_ref[...].astype(jnp.float32)
    o_ref[...] = y.astype(o_ref.dtype)


def matmul_bias_residual(h2, W, bias, res2):
    rows, k = h2.shape
    n_out = W.shape[1]
    tm, padded = _pick_row_tile(rows, k, h2.dtype.itemsize)
    tn = _pick_col_tile(n_out)
    if padded != rows:
        h2 = jnp.pad(h2, ((0, padded - rows), (0, 0)))
        res2 = jnp.pad(res2, ((0, padded - rows), (0, 0)))

    out = pl.pallas_call(
        _matmul_bias_res_kernel,
        out_shape=jax.ShapeDtypeStruct((padded, n_out), res2.dtype),
        grid_spec=pltpu.PrefetchScalarGridSpec(
            num_scalar_prefetch=0,
            grid=(pl.cdiv(padded, tm), pl.cdiv(n_out, tn)),
            in_specs=[
                pl.BlockSpec((tm, k), lambda i, j: (i, 0)),
                pl.BlockSpec((k, tn), lambda i, j: (0, j)),
                pl.BlockSpec((1, tn), lambda i, j: (0, j)),
                pl.BlockSpec((tm, tn), lambda i, j: (i, j)),
            ],
            out_specs=pl.BlockSpec((tm, tn), lambda i, j: (i, j)),
        ),
        compiler_params=_compiler_params(("parallel", "parallel")),
    )(h2, W, bias.reshape(1, n_out), res2)
    return out[:rows] if padded != rows else out


# ---------------------------------------------------------------------------
# Kernel 3: flash-style attention core
#   out = softmax(q @ k^T * scale) @ v, online softmax over KV tiles,
#   G (batch, head) pairs per grid step.
# Grid: (bh groups [parallel], q tiles [parallel], kv tiles [arbitrary]).
# ---------------------------------------------------------------------------

def _flash_attn_kernel(q_ref, k_ref, v_ref, o_ref, m_sc, l_sc, acc_sc, *,
                       scale, kv_len, tk, mask_kv):
    ki = pl.program_id(2)

    @pl.when(ki == 0)
    def _():
        m_sc[...] = jnp.full(m_sc.shape, -jnp.inf, jnp.float32)
        l_sc[...] = jnp.zeros(l_sc.shape, jnp.float32)
        acc_sc[...] = jnp.zeros(acc_sc.shape, jnp.float32)

    # Operands stay in input dtype (bf16 for bf16 models); fp32 accumulation.
    s = jnp.einsum("gqd,gkd->gqk", q_ref[...], k_ref[...],
                   preferred_element_type=jnp.float32) * scale      # (G, tq, tk)
    if mask_kv:  # mask padded / out-of-bounds key positions
        kv_idx = ki * tk + jax.lax.broadcasted_iota(jnp.int32, s.shape, 2)
        s = jnp.where(kv_idx < kv_len, s, -1e30)

    m_prev = m_sc[...]
    m_new = jnp.maximum(m_prev, jnp.max(s, axis=-1, keepdims=True))
    alpha = jnp.exp(m_prev - m_new)
    p = jnp.exp(s - m_new)
    l_sc[...] = alpha * l_sc[...] + jnp.sum(p, axis=-1, keepdims=True)
    acc_sc[...] = alpha * acc_sc[...] + jnp.einsum(
        "gqk,gkd->gqd", p.astype(v_ref.dtype), v_ref[...],
        preferred_element_type=jnp.float32)
    m_sc[...] = m_new

    @pl.when(ki == pl.num_programs(2) - 1)
    def _():
        o_ref[...] = (acc_sc[...] * pl.reciprocal(l_sc[...], approx=True)
                      ).astype(o_ref.dtype)


def _pick_attn_group(bh, tq, tk, d, itemsize, budget_bytes=8 << 20):
    """Largest divisor of bh whose per-step VMEM footprint (score/prob slabs +
    double-buffered q/k/v/out blocks + fp32 accumulator) stays under budget."""
    per = 4 * (2 * tq * tk + 2 * tq * d) + itemsize * 2 * (tq * d + 2 * tk * d)
    cap = max(1, budget_bytes // max(per, 1))
    g = 1
    for cand in range(1, bh + 1):
        if bh % cand == 0 and cand <= cap:
            g = cand
    return g


def flash_attention(q, k, v, *, scale):
    bh, n, d = q.shape
    n_pad = _round_up(n, 8)
    if n_pad != n:
        pad = ((0, 0), (0, n_pad - n), (0, 0))
        q, k, v = jnp.pad(q, pad), jnp.pad(k, pad), jnp.pad(v, pad)
    tq = min(256, n_pad)
    tk = min(512, n_pad)
    g = _pick_attn_group(bh, tq, tk, d, q.dtype.itemsize)
    n_kv_blocks = pl.cdiv(n_pad, tk)
    mask_kv = (n_kv_blocks * tk) != n   # padded or partial-tail key positions exist

    kernel = functools.partial(_flash_attn_kernel, scale=scale, kv_len=n,
                               tk=tk, mask_kv=mask_kv)
    out = pl.pallas_call(
        kernel,
        out_shape=jax.ShapeDtypeStruct((bh, n_pad, d), q.dtype),
        grid_spec=pltpu.PrefetchScalarGridSpec(
            num_scalar_prefetch=0,
            grid=(bh // g, pl.cdiv(n_pad, tq), n_kv_blocks),
            in_specs=[
                pl.BlockSpec((g, tq, d), lambda gi, qi, ki: (gi, qi, 0)),
                pl.BlockSpec((g, tk, d), lambda gi, qi, ki: (gi, ki, 0)),
                pl.BlockSpec((g, tk, d), lambda gi, qi, ki: (gi, ki, 0)),
            ],
            out_specs=pl.BlockSpec((g, tq, d), lambda gi, qi, ki: (gi, qi, 0)),
            scratch_shapes=[
                pltpu.VMEM((g, tq, 1), jnp.float32),    # running max m
                pltpu.VMEM((g, tq, 1), jnp.float32),    # running sum l
                pltpu.VMEM((g, tq, d), jnp.float32),    # fp32 accumulator
            ],
        ),
        compiler_params=_compiler_params(("parallel", "parallel", "arbitrary")),
    )(q, k, v)
    return out[:, :n] if n_pad != n else out


# ---------------------------------------------------------------------------
# Transformer module (parameters + forward using the kernels above)
# ---------------------------------------------------------------------------

def _xavier_uniform(key, fan_in, fan_out, dtype):
    limit = (6.0 / (fan_in + fan_out)) ** 0.5
    return jax.random.uniform(key, (fan_in, fan_out), dtype=dtype,
                              minval=-limit, maxval=limit)


class Transformer:
    """JAX/Pallas equivalent of the PyTorch Transformer(dim, depth, heads, mlp_dim, dropout).

    Weights are stored as (in, out) so kernels compute x @ W directly.
    Dropout is identity (inference mode)."""

    def __init__(self, dim, depth, heads, mlp_dim, dropout=0.1, *,
                 dtype=jnp.float32, key=None):
        assert dim % heads == 0, "dim must be divisible by heads"
        self.dim, self.depth, self.heads, self.mlp_dim = dim, depth, heads, mlp_dim
        # NOTE: the PyTorch source scales by dim ** -0.5 (NOT head_dim ** -0.5);
        # kept intentionally so kernel and reference agree with the spec.
        self.scale = dim ** (-0.5)
        self.eps = 1e-5
        if key is None:
            key = jax.random.PRNGKey(0)
        self.layers = []
        for _ in range(depth):
            key, k1, k2, k3, k4, k5, k6 = jax.random.split(key, 7)
            self.layers.append(dict(
                ln1_g=jnp.ones((dim,), dtype), ln1_b=jnp.zeros((dim,), dtype),
                Wqkv=_xavier_uniform(k1, dim, 3 * dim, dtype),
                bqkv=jnp.zeros((3 * dim,), dtype),
                Wo=_xavier_uniform(k2, dim, dim, dtype),
                bo=jnp.zeros((dim,), dtype),
                ln2_g=jnp.ones((dim,), dtype), ln2_b=jnp.zeros((dim,), dtype),
                W1=_xavier_uniform(k3, dim, mlp_dim, dtype),
                b1=1e-6 * jax.random.normal(k4, (mlp_dim,), dtype),
                W2=_xavier_uniform(k5, mlp_dim, dim, dtype),
                b2=1e-6 * jax.random.normal(k6, (dim,), dtype),
            ))

    def __call__(self, x, mask=None):
        assert mask is None  # TODO(synk): attention mask path not implemented
        b, n, dim = x.shape
        h = self.heads
        d = dim // h
        x2 = x.reshape(b * n, dim)
        for p in self.layers:
            # ---- Residual(LayerNormalize(Attention)) ----
            qkv = fused_ln_matmul(x2, p["ln1_g"], p["ln1_b"], p["Wqkv"], p["bqkv"],
                                  eps=self.eps)                        # (b*n, 3*dim)
            qkv = qkv.reshape(b, n, 3, h, d).transpose(2, 0, 3, 1, 4)  # (3, b, h, n, d)
            q = qkv[0].reshape(b * h, n, d)
            k = qkv[1].reshape(b * h, n, d)
            v = qkv[2].reshape(b * h, n, d)
            o = flash_attention(q, k, v, scale=self.scale)             # (b*h, n, d)
            o = o.reshape(b, h, n, d).transpose(0, 2, 1, 3).reshape(b * n, dim)
            x2 = matmul_bias_residual(o, p["Wo"], p["bo"], x2)         # proj + residual

            # ---- Residual(LayerNormalize(MLP_Block)) ----
            hid = fused_ln_matmul(x2, p["ln2_g"], p["ln2_b"], p["W1"], p["b1"],
                                  eps=self.eps, activation="gelu")     # (b*n, mlp_dim)
            x2 = matmul_bias_residual(hid, p["W2"], p["b2"], x2)       # proj + residual
        return x2.reshape(b, n, dim)


# ---------------------------------------------------------------------------
# Pure-JAX reference (mirrors the PyTorch forward, eval mode)
# ---------------------------------------------------------------------------

def _reference_transformer(x, layers, *, heads, scale, eps=1e-5):
    def ln(v, g, b):
        v32 = v.astype(jnp.float32)
        mean = jnp.mean(v32, axis=-1, keepdims=True)
        var = jnp.mean((v32 - mean) ** 2, axis=-1, keepdims=True)
        return (v32 - mean) * jax.lax.rsqrt(var + eps) * g + b

    b_, n_, dim = x.shape
    d = dim // heads
    for p in layers:
        xn = ln(x, p["ln1_g"], p["ln1_b"])
        qkv = xn @ p["Wqkv"] + p["bqkv"]
        qkv = qkv.reshape(b_, n_, 3, heads, d).transpose(2, 0, 3, 1, 4)
        q, k, v = qkv[0], qkv[1], qkv[2]
        dots = jnp.einsum("bhid,bhjd->bhij", q, k) * scale
        attn = jax.nn.softmax(dots, axis=-1)
        out = jnp.einsum("bhij,bhjd->bhid", attn, v)
        out = out.transpose(0, 2, 1, 3).reshape(b_, n_, dim)
        x = (out @ p["Wo"] + p["bo"] + x).astype(x.dtype)

        xn = ln(x, p["ln2_g"], p["ln2_b"])
        hdn = jax.nn.gelu(xn @ p["W1"] + p["b1"], approximate=False)
        x = (hdn @ p["W2"] + p["b2"] + x).astype(x.dtype)
    return x


if __name__ == "__main__":
    key = jax.random.PRNGKey(0)
    kx, kp = jax.random.split(key)

    batch, seq, dim, heads, mlp_dim, depth = 2, 8, 64, 8, 128, 2
    x = jax.random.normal(kx, (batch, seq, dim), dtype=jnp.float32)

    model = Transformer(dim, depth, heads, mlp_dim, dropout=0.1, key=kp)
    y = jax.block_until_ready(model(x))

    y_ref = _reference_transformer(x, model.layers, heads=heads, scale=model.scale)

    assert y.shape == x.shape and y.dtype == x.dtype
    err = float(jnp.max(jnp.abs(y - y_ref)))
    # 5e-3 absorbs the approximate EUP reciprocal in the softmax finalize while
    # still catching real bugs (errors from a wrong kernel are >= 1e-1 here).
    assert err < 5e-3, f"max abs error {err}"

    print("KERNEL_OK")
</pallas_src>

<mosaic_0001>
module attributes {stable_mosaic.version = 11 : i64} {
  func.func @_ln_matmul_kernel(%arg0: i32, %arg1: i32, %arg2: memref<16x64xf32, #tpu.memory_space<vmem>>, %arg3: memref<1x64xf32, #tpu.memory_space<vmem>>, %arg4: memref<1x64xf32, #tpu.memory_space<vmem>>, %arg5: memref<64x192xf32, #tpu.memory_space<vmem>>, %arg6: memref<1x192xf32, #tpu.memory_space<vmem>>, %arg7: memref<16x192xf32, #tpu.memory_space<vmem>>, %arg8: memref<16x64xf32, #tpu.memory_space<vmem>>) attributes {dimension_semantics = [#tpu.dimension_semantics<parallel>, #tpu.dimension_semantics<arbitrary>], iteration_bounds = array<i64: 1, 1>, scalar_prefetch = 0 : i64, scratch_operands = 1 : i64, tpu.core_type = #tpu.core_type<tc>, window_params = [{transform_indices = @transform_0, window_bounds = array<i64: 16, 64>}, {pipeline_mode = #tpu.pipeline_mode<synchronous>, transform_indices = @transform_1, window_bounds = array<i64: 1, 64>}, {pipeline_mode = #tpu.pipeline_mode<synchronous>, transform_indices = @transform_2, window_bounds = array<i64: 1, 64>}, {transform_indices = @transform_3, window_bounds = array<i64: 64, 192>}, {transform_indices = @transform_4, window_bounds = array<i64: 1, 192>}, {transform_indices = @transform_5, window_bounds = array<i64: 16, 192>}]} {
    %c0_i32 = arith.constant 0 : i32
    %0 = arith.cmpi eq, %arg1, %c0_i32 : i32
    %1 = arith.extui %0 : i1 to i32
    %c0_i32_0 = arith.constant 0 : i32
    %2 = arith.cmpi ne, %1, %c0_i32_0 : i32
    scf.if %2 {
      %c0_8 = arith.constant 0 : index
      %c0_9 = arith.constant 0 : index
      %10 = vector.load %arg2[%c0_8, %c0_9] : memref<16x64xf32, #tpu.memory_space<vmem>>, vector<16x64xf32>
      %cst_10 = arith.constant dense<0.000000e+00> : vector<16xf32>
      %11 = vector.multi_reduction <add>, %10, %cst_10 [1] : vector<16x64xf32> to vector<16xf32>
      %12 = vector.shape_cast %11 : vector<16xf32> to vector<16x1xf32>
      %cst_11 = arith.constant 1.562500e-02 : f32
      %13 = vector.broadcast %cst_11 : f32 to vector<16x1xf32>
      %14 = arith.mulf %12, %13 : vector<16x1xf32>
      %15 = vector.broadcast %14 : vector<16x1xf32> to vector<16x64xf32>
      %16 = arith.subf %10, %15 : vector<16x64xf32>
      %17 = arith.mulf %16, %16 : vector<16x64xf32>
      %cst_12 = arith.constant dense<0.000000e+00> : vector<16xf32>
      %18 = vector.multi_reduction <add>, %17, %cst_12 [1] : vector<16x64xf32> to vector<16xf32>
      %19 = vector.shape_cast %18 : vector<16xf32> to vector<16x1xf32>
      %cst_13 = arith.constant 1.562500e-02 : f32
      %20 = vector.broadcast %cst_13 : f32 to vector<16x1xf32>
      %21 = arith.mulf %19, %20 : vector<16x1xf32>
      %cst_14 = arith.constant 9.99999974E-6 : f32
      %22 = vector.broadcast %cst_14 : f32 to vector<16x1xf32>
      %23 = arith.addf %21, %22 : vector<16x1xf32>
      %24 = math.rsqrt %23 : vector<16x1xf32>
      %25 = vector.broadcast %24 : vector<16x1xf32> to vector<16x64xf32>
      %26 = arith.mulf %16, %25 : vector<16x64xf32>
      %c0_15 = arith.constant 0 : index
      %c0_16 = arith.constant 0 : index
      %27 = vector.load %arg3[%c0_15, %c0_16] : memref<1x64xf32, #tpu.memory_space<vmem>>, vector<1x64xf32>
      %28 = vector.broadcast %27 : vector<1x64xf32> to vector<16x64xf32>
      %29 = arith.mulf %26, %28 : vector<16x64xf32>
      %c0_17 = arith.constant 0 : index
      %c0_18 = arith.constant 0 : index
      %30 = vector.load %arg4[%c0_17, %c0_18] : memref<1x64xf32, #tpu.memory_space<vmem>>, vector<1x64xf32>
      %31 = vector.broadcast %30 : vector<1x64xf32> to vector<16x64xf32>
      %32 = arith.addf %29, %31 : vector<16x64xf32>
      %c0_19 = arith.constant 0 : index
      %c0_20 = arith.constant 0 : index
      %33 = vector.load %arg8[%c0_19, %c0_20] : memref<16x64xf32, #tpu.memory_space<vmem>>, vector<16x64xf32>
      tpu.vector_store %arg8[%c0_19, %c0_20], %32 {strides = array<i32>} : memref<16x64xf32, #tpu.memory_space<vmem>>, vector<16x64xf32>,
    } else {
    }
    %c0 = arith.constant 0 : index
    %c0_1 = arith.constant 0 : index
    %3 = vector.load %arg8[%c0, %c0_1] : memref<16x64xf32, #tpu.memory_space<vmem>>, vector<16x64xf32>
    %c0_2 = arith.constant 0 : index
    %c0_3 = arith.constant 0 : index
    %4 = vector.load %arg5[%c0_2, %c0_3] : memref<64x192xf32, #tpu.memory_space<vmem>>, vector<64x192xf32>
    %cst = arith.constant dense<0.000000e+00> : vector<16x192xf32>
    %5 = tpu.matmul %3, %4, %cst {dimension_numbers = #tpu.dot_dimension_numbers<[1], [0], [0], [1], [0, 0, 1, 1], [], []>} : vector<16x64xf32>, vector<64x192xf32>, vector<16x192xf32> -> vector<16x192xf32>
    %c0_4 = arith.constant 0 : index
    %c0_5 = arith.constant 0 : index
    %6 = vector.load %arg6[%c0_4, %c0_5] : memref<1x192xf32, #tpu.memory_space<vmem>>, vector<1x192xf32>
    %7 = vector.broadcast %6 : vector<1x192xf32> to vector<16x192xf32>
    %8 = arith.addf %5, %7 : vector<16x192xf32>
    %c0_6 = arith.constant 0 : index
    %c0_7 = arith.constant 0 : index
    %9 = vector.load %arg7[%c0_6, %c0_7] : memref<16x192xf32, #tpu.memory_space<vmem>>, vector<16x192xf32>
    tpu.vector_store %arg7[%c0_6, %c0_7], %8 {strides = array<i32>} : memref<16x192xf32, #tpu.memory_space<vmem>>, vector<16x192xf32>,
    return
  }
  func.func @transform_0(%arg0: i32, %arg1: i32) -> (i32, i32) {
    %c0_i32 = arith.constant 0 : i32
    %c0_i32_0 = arith.constant 0 : i32
    return %arg0, %c0_i32 : i32, i32
  }
  func.func @transform_1(%arg0: i32, %arg1: i32) -> (i32, i32) {
    %c0_i32 = arith.constant 0 : i32
    %c0_i32_0 = arith.constant 0 : i32
    %c0_i32_1 = arith.constant 0 : i32
    return %c0_i32, %c0_i32_0 : i32, i32
  }
  func.func @transform_2(%arg0: i32, %arg1: i32) -> (i32, i32) {
    %c0_i32 = arith.constant 0 : i32
    %c0_i32_0 = arith.constant 0 : i32
    %c0_i32_1 = arith.constant 0 : i32
    return %c0_i32, %c0_i32_0 : i32, i32
  }
  func.func @transform_3(%arg0: i32, %arg1: i32) -> (i32, i32) {
    %c0_i32 = arith.constant 0 : i32
    %c0_i32_0 = arith.constant 0 : i32
    return %c0_i32, %arg1 : i32, i32
  }
  func.func @transform_4(%arg0: i32, %arg1: i32) -> (i32, i32) {
    %c0_i32 = arith.constant 0 : i32
    %c0_i32_0 = arith.constant 0 : i32
    return %c0_i32, %arg1 : i32, i32
  }
  func.func @transform_5(%arg0: i32, %arg1: i32) -> (i32, i32) {
    %c0_i32 = arith.constant 0 : i32
    return %arg0, %arg1 : i32, i32
  }
}

</mosaic_0001>

<bundles_post_ra>
// kernel: tpu_custom_call.1
= control target key start
LH: loop header
LB: loop body
LE: loop exit
PB: predicated region body
PF: predicated region fallthrough
CT: control target
= control target key end

     0   :  { %10 = vsyncpa [#allocation4], 0  ;;  %s451_s0 = inlined_call_operand.hbm [shape: f32[16,64], index: 0, kind: input, shape index: {}]   ;;  %s452_s1 = inlined_call_operand.vmem [shape: f32[1,64], index: 1, kind: input, shape index: {}]   ;;  %s453_s2 = inlined_call_operand.hbm [shape: f32[1,64], index: 2, kind: input, shape index: {}]   ;;  %s454_s3 = inlined_call_operand.hbm [shape: f32[64,192], index: 3, kind: input, shape index: {}]   ;;  %s455_s4 = inlined_call_operand.vmem [shape: f32[1,192], index: 4, kind: input, shape index: {}]   ;;  %s456_s5 = inlined_call_operand.hbm [shape: f32[16,192], index: 5, kind: output, shape index: {}]  }
   0x1   :  { %11 = vsyncpa [#allocation7], 0 }
   0x2   :  { %12 = vsyncpa [#allocation5], 0  ;;  %s368_s18 = smov [#allocation6]   ;;  %s369_s20 = smov [#allocation3]  }
   0x3   :  { %s33_s19 = sshll.u32 %s368_s18, 4  ;;  %s18_s21 = sshll.u32 %s369_s20, 4  ;;  %s34_s19 = int_to_ptr.vmem [resolvable:$true] %s33_s19  ;;  %s19_s21 = int_to_ptr.vmem [resolvable:$true] %s18_s21 }
   0x4   :  { %s290_s22 = scalar_lea.vmem %s34_s19, 16  ;;  %s294_s23 = scalar_lea.vmem %s34_s19, 32 }
   0x5   :  { %p291_p0 = scmp.ne.s32.totalorder %s34_s19, %s290_s22  ;;  %p295_p1 = scmp.lt.s32.totalorder %s34_s19, %s34_s19 }
   0x6   :  { %p296_p2 = scmp.lt.s32.totalorder %s294_s23, %s290_s22 }
   0x8   :  { %p297_p3 = por %p296_p2, %p295_p1 }
   0xa   :  { %p298_p4 = pnand %p297_p3, %p291_p0 }
   0xc   :  { %301 = shalt.err (!%p298_p4)
}
   0xd   :  { %36 = dma.hbm_to_vmem [thread:$0]  %s453_s2, 16, %s34_s19, [#allocation7]  }
   0xe   :  { %s310_s26 = scalar_lea.vmem %s19_s21, 256  ;;  %p315_p6 = scmp.lt.s32.totalorder %s19_s21, %s19_s21 }
   0xf   :  { %p311_p5 = scmp.ne.s32.totalorder %s19_s21, %s310_s26  ;;  %p316_p7 = scmp.lt.s32.totalorder %s310_s26, %s310_s26 }
  0x11   :  { %p317_p8 = por %p316_p7, %p315_p6 }
  0x13   :  { %p318_p9 = pnand %p317_p8, %p311_p5 }
  0x15   :  { %321 = shalt.err (!%p318_p9)
}
  0x16   :  { %s370_s27 = smov 128   ;;  %s371_s28 = smov 8  }
  0x17   :  { %24 = dma.hbm_to_vmem [thread:$0]  %s451_s0, 256, %s19_s21, [#allocation4], %s370_s27, %s370_s27, %s371_s28  }
  0x18   :  { %s372_s6 = smov [#allocation8]  }
  0x19   :  { %s42_s7 = sshll.u32 %s372_s6, 4  ;;  %s43_s7 = int_to_ptr.vmem [resolvable:$true] %s42_s7 }
  0x1a   :  { %s330_s8 = scalar_lea.vmem %s43_s7, 2048  ;;  %p335_p11 = scmp.lt.s32.totalorder %s43_s7, %s43_s7 }
  0x1b   :  { %p331_p10 = scmp.ne.s32.totalorder %s43_s7, %s330_s8  ;;  %p336_p12 = scmp.lt.s32.totalorder %s330_s8, %s330_s8 }
  0x1d   :  { %p337_p13 = por %p336_p12, %p335_p11 }
  0x1f   :  { %p338_p0 = pnand %p337_p13, %p331_p10 }
  0x21   :  { %341 = shalt.err (!%p338_p0)
}
  0x22   :  { %s373_s2 = smov 256   ;;  %s374_s9 = smov 16  }
  0x23   :  { %48 = dma.hbm_to_vmem [thread:$0]  %s454_s3, 2048, %s43_s7, [#allocation7], %s373_s2, %s373_s2, %s374_s9  }
  0x24   :  { %362 = dma.done.wait [#allocation4], 256  }
  0x25   :  { %363 = vsyncadd [#allocation4], 4294967040 }
  0x26   :  { %364 = dma.done.wait [#allocation7], 2064  }
  0x27   :  { %365 = vsyncadd [#allocation7], 4294965232  ;;  %vm66_vm0 = vcmask 523264   ;;  %v64_v0 = vld [vmem:[#allocation3] sm:$0xff]  ;;  %v65_v1 = vld [vmem:[#allocation3 + $0x8] sm:$0xff]  ;;  %v375_v30 = vmov 0.0   ;;  %v133_v49 = vlaneseq }
  0x28   :  { %v67_v2 = vsel %vm66_vm0, %v64_v0, 0.0  ;;  %v70_v3 = vsel %vm66_vm0, %v65_v1, 0.0  ;;  %v130_v14 = vld [vmem:[#allocation8 + $0x78] sm:$0xff]  ;;  %v129_v15 = vld [vmem:[#allocation8 + $0x70] sm:$0xff]  ;;  %v128_v16 = vld [vmem:[#allocation8 + $0x68] sm:$0xff]  ;;  %214 = vmatprep.mubr.f32.mxu0 %v375_v30  ;;  %220 = vmatprep.mubr.f32.mxu1 %v375_v30  ;;  %s376_s13 = smov [#allocation9]  }
  0x29   :  { %68 = vadd.xlane.f32.xlu0 %v67_v2  ;;  %166 = vmatprep.subr.mxu0 %v130_v14  ;;  %v127_v17 = vld [vmem:[#allocation8 + $0x60] sm:$0xff]  ;;  %v126_v18 = vld [vmem:[#allocation8 + $0x58] sm:$0xff]  ;;  %v125_v19 = vld [vmem:[#allocation8 + $0x50] sm:$0xff]  ;;  %v134_v50 = vshrl.u32 %v133_v49, 7  ;;  %s236_s14 = sshll.u32 %s376_s13, 4  ;;  %s237_s14 = int_to_ptr.vmem [resolvable:$true] %s236_s14 }
  0x2a   :  { %253 = vmatprep.subr.mxu1 %v130_v14  ;;  %167 = vmatpush1.msra.mxu0 %v129_v15  ;;  %v124_v20 = vld [vmem:[#allocation8 + $0x48] sm:$0xff]  ;;  %v123_v21 = vld [vmem:[#allocation8 + $0x40] sm:$0xff]  ;;  %v122_v22 = vld [vmem:[#allocation8 + $0x38] sm:$0xff]  ;;  %p347_p2 = scmp.lt.s32.totalorder %s237_s14, %s237_s14 }
  0x2b   :  { %261 = vmatpush1.msra.mxu1 %v129_v15  ;;  %168 = vmatprep.subr.mxu0 %v128_v16  ;;  %v121_v23 = vld [vmem:[#allocation8 + $0x30] sm:$0xff]  ;;  %v120_v24 = vld [vmem:[#allocation8 + $0x28] sm:$0xff]  ;;  %v119_v25 = vld [vmem:[#allocation8 + $0x20] sm:$0xff]  ;;  %v135_v51 = vsub.s32 0, %v134_v50  ;;  %v139_v53 = vsub.s32 1, %v134_v50 }
  0x2c   :  { %254 = vmatprep.subr.mxu1 %v128_v16  ;;  %169 = vmatpush1.msra.mxu0 %v127_v17  ;;  %v118_v26 = vld [vmem:[#allocation8 + $0x18] sm:$0xff]  ;;  %v117_v27 = vld [vmem:[#allocation8 + $0x10] sm:$0xff]  ;;  %v116_v28 = vld [vmem:[#allocation8 + $0x8] sm:$0xff] }
  0x2d   :  { %71 = vadd.xlane.f32.xlu0 %v70_v3  ;;  %262 = vmatpush1.msra.mxu1 %v127_v17  ;;  %v115_v29 = vld [vmem:[#allocation8] sm:$0xff]  ;;  %v249_v38 = vld [vmem:[%s452_s1] ss:$0 sm:$0xff] }
  0x2e   :  { %170 = vmatprep.subr.mxu0 %v126_v18  ;;  %255 = vmatprep.subr.mxu1 %v126_v18  ;;  %v250_v40 = vld [vmem:[#allocation6] ss:$0 sm:$0xff] }
  0x2f   :  { %171 = vmatpush1.msra.mxu0 %v125_v19  ;;  %263 = vmatpush1.msra.mxu1 %v125_v19  ;;  %v131_v52 = vld [vmem:[%s455_s4] sm:$0x3]  ;;  %s342_s4 = scalar_lea.vmem %s237_s14, 512 }
  0x30   :  { %172 = vmatprep.subr.mxu0 %v124_v20  ;;  %256 = vmatprep.subr.mxu1 %v124_v20  ;;  %v136_v54 = vrot.slane %v131_v52, %v135_v51  ;;  %v140_v55 = vrot.slane %v131_v52, %v139_v53  ;;  %p343_p1 = scmp.ne.s32.totalorder %s237_s14, %s342_s4  ;;  %p348_p3 = scmp.lt.s32.totalorder %s342_s4, %s342_s4 }
  0x31   :  { %173 = vmatpush1.msra.mxu0 %v123_v21  ;;  %264 = vmatpush1.msra.mxu1 %v123_v21 }
  0x32   :  { %174 = vmatprep.subr.mxu0 %v122_v22  ;;  %257 = vmatprep.subr.mxu1 %v122_v22  ;;  %p349_p4 = por %p348_p3, %p347_p2 }
  0x33   :  { %175 = vmatpush1.msra.mxu0 %v121_v23  ;;  %265 = vmatpush1.msra.mxu1 %v121_v23 }
  0x34   :  { %176 = vmatprep.subr.mxu0 %v120_v24  ;;  %258 = vmatprep.subr.mxu1 %v120_v24  ;;  %p350_p5 = pnand %p349_p4, %p343_p1 }
  0x35   :  { %177 = vmatpush1.msra.mxu0 %v119_v25  ;;  %266 = vmatpush1.msra.mxu1 %v119_v25 }
  0x36   :  { %178 = vmatprep.subr.mxu0 %v118_v26  ;;  %259 = vmatprep.subr.mxu1 %v118_v26 }
  0x37   :  { %179 = vmatpush1.msra.mxu0 %v117_v27  ;;  %267 = vmatpush1.msra.mxu1 %v117_v27 }
  0x38   :  { %180 = vmatprep.subr.mxu0 %v116_v28  ;;  %260 = vmatprep.subr.mxu1 %v116_v28 }
  0x39   :  { %181 = vmatpush1.msra.mxu0 %v115_v29  ;;  %268 = vmatpush1.msra.mxu1 %v115_v29 }
  0xb2   :  { %v69_v4 = vpop.xlane.xlu0 %68 }
  0xb3   :  { %v73_v5 = vmul.f32 0.015625, %v69_v4 }
  0xb5   :  { %v421_v6 = vsub.f32 %v64_v0, %v73_v5 }
  0xb6   :  { %v72_v7 = vpop.xlane.xlu0 %71 }
  0xb7   :  { %v74_v8 = vmul.f32 0.015625, %v72_v7  ;;  %v77_v9 = vmul.f32 %v421_v6, %v421_v6 }
  0xb9   :  { %v425_v10 = vsub.f32 %v65_v1, %v74_v8  ;;  %v79_v11 = vsel %vm66_vm0, %v77_v9, 0.0 }
  0xba   :  { %80 = vadd.xlane.f32.xlu1 %v79_v11 }
  0xbb   :  { %v78_v12 = vmul.f32 %v425_v10, %v425_v10 }
  0xbd   :  { %v82_v13 = vsel %vm66_vm0, %v78_v12, 0.0 }
  0xbe   :  { %83 = vadd.xlane.f32.xlu1 %v82_v13 }
 0x143   :  { %v81_v31 = vpop.xlane.xlu1 %80 }
 0x144   :  { %v85_v32 = vmul.f32 0.015625, %v81_v31 }
 0x146   :  { %v87_v33 = vadd.f32 1e-05, %v85_v32 }
 0x147   :  { %v84_v34 = vpop.xlane.xlu1 %83 }
 0x148   :  { %278 = vrsqrt.f32 %v87_v33  ;;  %v86_v35 = vmul.f32 0.015625, %v84_v34 }
 0x14a   :  { %v88_v36 = vadd.f32 1e-05, %v86_v35 }
 0x14c   :  { %280 = vrsqrt.f32 %v88_v36 }
 0x155   :  { %v279_v37 = vpop.eup %278 }
 0x156   :  { %v91_v39 = vmul.f32 %v279_v37, %v421_v6 }
 0x158   :  { %v100_v41 = vmul.f32 %v249_v38, %v91_v39 }
 0x159   :  { %v281_v42 = vpop.eup %280 }
 0x15a   :  { %v109_v43 = vadd.f32 %v250_v40, %v100_v41  ;;  %v92_v44 = vmul.f32 %v281_v42, %v425_v10 }
 0x15c   :  { %111 = vst.msk [vmem:[#allocation2] sm:$0xff] %vm66_vm0, %v109_v43  ;;  %v101_v45 = vmul.f32 %v249_v38, %v92_v44 }
 0x15e   :  { %v110_v46 = vadd.f32 %v250_v40, %v101_v45 }
 0x160   :  { %112 = vst.msk [vmem:[#allocation2 + $0x8] sm:$0xff] %vm66_vm0, %v110_v46 }
 0x163   :  { %v113_v47 = vld [vmem:[#allocation2] sm:$0xff] }
 0x164   :  { %251 = vmatmul.mubr.msk.f32.vlgmr.msra.gmra.mxu0 %vm66_vm0, %v113_v47 }
 0x167   :  { %v114_v48 = vld [vmem:[#allocation2 + $0x8] sm:$0xff] }
 0x168   :  { %252 = vmatmul.mubr.msk.f32.vlgmr.msra.gmra.mxu1 %vm66_vm0, %v114_v48 }
 0x224   :  { %v216_v56 = vpop.f32.mrf.mxu0 }
 0x225   :  { %v217_v57 = vadd.f32 %v216_v56, %v136_v54 }
 0x226   :  { %v218_v58 = vpop.f32.mrf.mxu0 }
 0x227   :  { %227 = vst [vmem:[#allocation9] sm:$0xff] %v217_v57  ;;  %v219_v59 = vadd.f32 %v218_v58, %v140_v55 }
 0x228   :  { %v222_v60 = vpop.f32.mrf.mxu1 }
 0x229   :  { %228 = vst.msk [vmem:[#allocation9 + $0x8] sm:$0xff] %vm66_vm0, %v219_v59  ;;  %v223_v61 = vadd.f32 %v222_v60, %v136_v54 }
 0x22a   :  { %v224_v62 = vpop.f32.mrf.mxu1 }
 0x22b   :  { %229 = vst [vmem:[#allocation9 + $0x10] sm:$0xff] %v223_v61  ;;  %v225_v63 = vadd.f32 %v224_v62, %v140_v55 }
 0x22d   :  { %230 = vst.msk [vmem:[#allocation9 + $0x18] sm:$0xff] %vm66_vm0, %v225_v63 }
 0x22e   :  { %353 = shalt.err (!%p350_p5)
}
 0x22f   :  { %242 = dma.vmem_to_hbm [thread:$0]  %s237_s14, 512, %s456_s5, [#allocation5], %s373_s2, %s373_s2, %s374_s9  }
 0x230   :  { %366 = dma.done.wait [#allocation5], 512  }
 0x231   :  { %367 = vsyncadd [#allocation5], 4294966784 }
 0x232   :  { %246 = vsyncpa [#allocation4], 1 }
 0x233   :  { %247 = vsyncpa [#allocation7], 1 }
 0x234   :  { %248 = vsyncpa [#allocation5], 1 }

</bundles_post_ra>
